<compile_context>
chip_gen: v5e
topology: v5e:2x2
jax: 0.10.0
libtpu: 0.0.40
codegen_flags: <defaults>
</compile_context>

<pallas_src>
import jax
import jax.numpy as jnp
from jax.experimental import pallas as pl
from jax.experimental.pallas import tpu as pltpu

_LANE = 128      # lane width (last dim)
_SUBLANE = 8     # f32 sublane height (second-to-last dim)


def _round_up(x, m):
    return (x + m - 1) // m * m


# -----------------------------------------------------------------------------
# Pallas kernel: fused  (Linear -> ReLU) x 2  ->  Linear     (all dims padded
# to lane/MXU-friendly sizes by the wrapper; padding columns are exact zeros).
# -----------------------------------------------------------------------------
def _mlp_kernel(x_ref, w1_ref, b1_ref, w2_ref, b2_ref, w3_ref, b3_ref, o_ref):
    # hidden layer 1
    h = jnp.dot(x_ref[...], w1_ref[...], preferred_element_type=jnp.float32)
    h = jnp.maximum(h + b1_ref[...], 0.0)
    # hidden layer 2
    h = jnp.dot(h, w2_ref[...], preferred_element_type=jnp.float32)
    h = jnp.maximum(h + b2_ref[...], 0.0)
    # output layer (no activation) — lane-dense (multiple-of-128) store
    out = jnp.dot(h, w3_ref[...], preferred_element_type=jnp.float32) + b3_ref[...]
    o_ref[...] = out.astype(o_ref.dtype)


def _pad_params(params):
    """Zero-pad weights/biases so in/hidden/output dims are multiples of 128.

    Zero pads are exact: padded w1 rows multiply padded (zero) x features,
    padded hidden columns get zero bias -> ReLU(0) = 0 -> contribute nothing to
    the next matmul, and padded logit columns are sliced off by the wrapper.
    """
    w1, b1 = params["w1"], params["b1"]
    w2, b2 = params["w2"], params["b2"]
    w3, b3 = params["w3"], params["b3"]
    d_in, hid = w1.shape
    nb = w3.shape[1]
    d_in_p = _round_up(d_in, _LANE)
    hid_p = _round_up(hid, _LANE)
    nb_p = _round_up(nb, _LANE)

    w1p = jnp.zeros((d_in_p, hid_p), jnp.float32).at[:d_in, :hid].set(w1)
    b1p = jnp.zeros((1, hid_p), jnp.float32).at[:, :hid].set(b1)
    w2p = jnp.zeros((hid_p, hid_p), jnp.float32).at[:hid, :hid].set(w2)
    b2p = jnp.zeros((1, hid_p), jnp.float32).at[:, :hid].set(b2)
    w3p = jnp.zeros((hid_p, nb_p), jnp.float32).at[:hid, :nb].set(w3)
    b3p = jnp.zeros((1, nb_p), jnp.float32).at[:, :nb].set(b3)
    return (w1p, b1p, w2p, b2p, w3p, b3p), d_in_p, hid_p, nb_p


def mlp_forward(x_nchw, params, *, down_sample=1, batch_tile=512):
    """Forward pass equivalent to MLP.forward(x).

    x_nchw : (B, C, H, W) float32
    params : dict with w1 (D_in, H), b1 (1, H), w2 (H, H), b2 (1, H),
             w3 (H, nb_classes), b3 (1, nb_classes)
    """
    if down_sample > 1:
        # nn.MaxPool2d(down_sample) — non-overlapping max pooling (glue, not hot path)
        B, C, H, W = x_nchw.shape
        Hs, Ws = H // down_sample, W // down_sample
        x_nchw = x_nchw[:, :, : Hs * down_sample, : Ws * down_sample]
        x_nchw = x_nchw.reshape(B, C, Hs, down_sample, Ws, down_sample).max(axis=(3, 5))

    B = x_nchw.shape[0]
    d_in = params["w1"].shape[0]
    nb_classes = params["w3"].shape[1]

    # x.view(-1, input_size)
    x = x_nchw.reshape(B, d_in).astype(jnp.float32)

    # zero-pad params to lane-dense shapes
    (w1p, b1p, w2p, b2p, w3p, b3p), d_in_p, hid_p, nb_p = _pad_params(params)

    # pad x feature dim to match padded w1 rows (zero rows -> no effect)
    if d_in_p != d_in:
        x = jnp.pad(x, ((0, 0), (0, d_in_p - d_in)))

    # --- batch tiling -------------------------------------------------------
    # Large tiles amortize the ~0.35 us per-grid-step overhead and keep the x
    # DMA near the HBM roofline.  When the batch is big enough, keep >= 2 grid
    # steps so the "parallel" batch axis can shard across both v7x TensorCores.
    b_pad8 = _round_up(B, _SUBLANE)
    n_steps = pl.cdiv(b_pad8, min(batch_tile, b_pad8))
    if n_steps < 2 and b_pad8 >= 2 * _SUBLANE:
        n_steps = 2
    tb = _round_up(pl.cdiv(b_pad8, n_steps), _SUBLANE)
    b_pad = n_steps * tb
    if b_pad != B:
        x = jnp.pad(x, ((0, b_pad - B), (0, 0)))

    # advisory cost estimate so XLA schedules the surrounding glue correctly
    flops = 2 * b_pad * (d_in_p * hid_p + hid_p * hid_p + hid_p * nb_p)
    bytes_accessed = 4 * (
        b_pad * d_in_p                      # x stream (dominant)
        + d_in_p * hid_p + hid_p * hid_p + hid_p * nb_p  # weights
        + 2 * hid_p + nb_p                  # biases
        + b_pad * nb_p                      # output
    )
    cost = pl.CostEstimate(flops=flops, transcendentals=0,
                           bytes_accessed=bytes_accessed)

    out = pl.pallas_call(
        _mlp_kernel,
        out_shape=jax.ShapeDtypeStruct((b_pad, nb_p), jnp.float32),
        grid_spec=pltpu.PrefetchScalarGridSpec(
            num_scalar_prefetch=0,
            grid=(n_steps,),
            in_specs=[
                pl.BlockSpec((tb, d_in_p), lambda i: (i, 0)),   # x tile (streamed)
                # weights/biases: constant index maps -> fetched once, resident
                pl.BlockSpec(w1p.shape, lambda i: (0, 0)),
                pl.BlockSpec(b1p.shape, lambda i: (0, 0)),
                pl.BlockSpec(w2p.shape, lambda i: (0, 0)),
                pl.BlockSpec(b2p.shape, lambda i: (0, 0)),
                pl.BlockSpec(w3p.shape, lambda i: (0, 0)),
                pl.BlockSpec(b3p.shape, lambda i: (0, 0)),
            ],
            out_specs=pl.BlockSpec((tb, nb_p), lambda i: (i, 0)),  # lane-dense out
        ),
        compiler_params=pltpu.CompilerParams(
            dimension_semantics=("parallel",),
        ),
        cost_estimate=cost,
    )(x, w1p, b1p, w2p, b2p, w3p, b3p)

    # drop batch padding and padded logit columns
    return out[:B, :nb_classes]


# -----------------------------------------------------------------------------
# Deterministic parameter init (PyTorch nn.Linear default: U(-1/sqrt(fan_in), +))
# -----------------------------------------------------------------------------
def init_params(key, d_in, hid_nodes, nb_classes):
    def linear(k, fan_in, fan_out):
        kw, kb = jax.random.split(k)
        bound = 1.0 / jnp.sqrt(fan_in)
        w = jax.random.uniform(kw, (fan_in, fan_out), jnp.float32, -bound, bound)
        b = jax.random.uniform(kb, (1, fan_out), jnp.float32, -bound, bound)
        return w, b

    k1, k2, k3 = jax.random.split(key, 3)
    w1, b1 = linear(k1, d_in, hid_nodes)
    w2, b2 = linear(k2, hid_nodes, hid_nodes)
    w3, b3 = linear(k3, hid_nodes, nb_classes)
    return dict(w1=w1, b1=b1, w2=w2, b2=b2, w3=w3, b3=b3)


if __name__ == "__main__":
    # small shapes consistent with the module:
    # batch=2, in_channels=1, input_size=16, down_sample=1, hid_nodes=32,
    # hid_layers=2 (fused kernel specialized to 2 hidden layers), nb_classes=10
    B, C, HW = 2, 1, 16
    hid_nodes, nb_classes, down_sample = 32, 10, 1
    d_in = (HW // down_sample) * (HW // down_sample) * C  # = 256

    key = jax.random.PRNGKey(0)
    kx, kp = jax.random.split(key)
    x = jax.random.normal(kx, (B, C, HW, HW), jnp.float32)
    params = init_params(kp, d_in, hid_nodes, nb_classes)

    y = mlp_forward(x, params, down_sample=down_sample)
    y = jax.block_until_ready(y)

    # cross-check against plain-JAX reference (unpadded params)
    xf = x.reshape(B, d_in)
    h = jnp.maximum(xf @ params["w1"] + params["b1"], 0.0)
    h = jnp.maximum(h @ params["w2"] + params["b2"], 0.0)
    ref = h @ params["w3"] + params["b3"]
    assert y.shape == (B, nb_classes)
    assert jnp.allclose(y, ref, atol=1e-4, rtol=1e-4)

    print("KERNEL_OK")
</pallas_src>

<mosaic_0001>
module attributes {stable_mosaic.version = 11 : i64} {
  func.func @_mlp_kernel(%arg0: i32, %arg1: memref<8x256xf32, #tpu.memory_space<vmem>>, %arg2: memref<256x128xf32, #tpu.memory_space<vmem>>, %arg3: memref<1x128xf32, #tpu.memory_space<vmem>>, %arg4: memref<128x128xf32, #tpu.memory_space<vmem>>, %arg5: memref<1x128xf32, #tpu.memory_space<vmem>>, %arg6: memref<128x128xf32, #tpu.memory_space<vmem>>, %arg7: memref<1x128xf32, #tpu.memory_space<vmem>>, %arg8: memref<8x128xf32, #tpu.memory_space<vmem>>) attributes {dimension_semantics = [#tpu.dimension_semantics<parallel>], iteration_bounds = array<i64: 1>, scalar_prefetch = 0 : i64, scratch_operands = 0 : i64, tpu.core_type = #tpu.core_type<tc>, window_params = [{transform_indices = @transform_0, window_bounds = array<i64: 8, 256>}, {pipeline_mode = #tpu.pipeline_mode<synchronous>, transform_indices = @transform_1, window_bounds = array<i64: 256, 128>}, {pipeline_mode = #tpu.pipeline_mode<synchronous>, transform_indices = @transform_2, window_bounds = array<i64: 1, 128>}, {pipeline_mode = #tpu.pipeline_mode<synchronous>, transform_indices = @transform_3, window_bounds = array<i64: 128, 128>}, {pipeline_mode = #tpu.pipeline_mode<synchronous>, transform_indices = @transform_4, window_bounds = array<i64: 1, 128>}, {pipeline_mode = #tpu.pipeline_mode<synchronous>, transform_indices = @transform_5, window_bounds = array<i64: 128, 128>}, {pipeline_mode = #tpu.pipeline_mode<synchronous>, transform_indices = @transform_6, window_bounds = array<i64: 1, 128>}, {transform_indices = @transform_7, window_bounds = array<i64: 8, 128>}]} {
    %c0 = arith.constant 0 : index
    %c0_0 = arith.constant 0 : index
    %0 = vector.load %arg1[%c0, %c0_0] : memref<8x256xf32, #tpu.memory_space<vmem>>, vector<8x256xf32>
    %c0_1 = arith.constant 0 : index
    %c0_2 = arith.constant 0 : index
    %1 = vector.load %arg2[%c0_1, %c0_2] : memref<256x128xf32, #tpu.memory_space<vmem>>, vector<256x128xf32>
    %cst = arith.constant dense<0.000000e+00> : vector<8x128xf32>
    %2 = tpu.matmul %0, %1, %cst {dimension_numbers = #tpu.dot_dimension_numbers<[1], [0], [0], [1], [0, 0, 1, 1], [], []>} : vector<8x256xf32>, vector<256x128xf32>, vector<8x128xf32> -> vector<8x128xf32>
    %c0_3 = arith.constant 0 : index
    %c0_4 = arith.constant 0 : index
    %3 = vector.load %arg3[%c0_3, %c0_4] : memref<1x128xf32, #tpu.memory_space<vmem>>, vector<1x128xf32>
    %4 = vector.broadcast %3 : vector<1x128xf32> to vector<8x128xf32>
    %5 = arith.addf %2, %4 : vector<8x128xf32>
    %cst_5 = arith.constant 0.000000e+00 : f32
    %6 = vector.broadcast %cst_5 : f32 to vector<8x128xf32>
    %7 = arith.maximumf %5, %6 : vector<8x128xf32>
    %c0_6 = arith.constant 0 : index
    %c0_7 = arith.constant 0 : index
    %8 = vector.load %arg4[%c0_6, %c0_7] : memref<128x128xf32, #tpu.memory_space<vmem>>, vector<128x128xf32>
    %cst_8 = arith.constant dense<0.000000e+00> : vector<8x128xf32>
    %9 = tpu.matmul %7, %8, %cst_8 {dimension_numbers = #tpu.dot_dimension_numbers<[1], [0], [0], [1], [0, 0, 1, 1], [], []>} : vector<8x128xf32>, vector<128x128xf32>, vector<8x128xf32> -> vector<8x128xf32>
    %c0_9 = arith.constant 0 : index
    %c0_10 = arith.constant 0 : index
    %10 = vector.load %arg5[%c0_9, %c0_10] : memref<1x128xf32, #tpu.memory_space<vmem>>, vector<1x128xf32>
    %11 = vector.broadcast %10 : vector<1x128xf32> to vector<8x128xf32>
    %12 = arith.addf %9, %11 : vector<8x128xf32>
    %cst_11 = arith.constant 0.000000e+00 : f32
    %13 = vector.broadcast %cst_11 : f32 to vector<8x128xf32>
    %14 = arith.maximumf %12, %13 : vector<8x128xf32>
    %c0_12 = arith.constant 0 : index
    %c0_13 = arith.constant 0 : index
    %15 = vector.load %arg6[%c0_12, %c0_13] : memref<128x128xf32, #tpu.memory_space<vmem>>, vector<128x128xf32>
    %cst_14 = arith.constant dense<0.000000e+00> : vector<8x128xf32>
    %16 = tpu.matmul %14, %15, %cst_14 {dimension_numbers = #tpu.dot_dimension_numbers<[1], [0], [0], [1], [0, 0, 1, 1], [], []>} : vector<8x128xf32>, vector<128x128xf32>, vector<8x128xf32> -> vector<8x128xf32>
    %c0_15 = arith.constant 0 : index
    %c0_16 = arith.constant 0 : index
    %17 = vector.load %arg7[%c0_15, %c0_16] : memref<1x128xf32, #tpu.memory_space<vmem>>, vector<1x128xf32>
    %18 = vector.broadcast %17 : vector<1x128xf32> to vector<8x128xf32>
    %19 = arith.addf %16, %18 : vector<8x128xf32>
    %c0_17 = arith.constant 0 : index
    %c0_18 = arith.constant 0 : index
    %20 = vector.load %arg8[%c0_17, %c0_18] : memref<8x128xf32, #tpu.memory_space<vmem>>, vector<8x128xf32>
    tpu.vector_store %arg8[%c0_17, %c0_18], %19 {strides = array<i32>} : memref<8x128xf32, #tpu.memory_space<vmem>>, vector<8x128xf32>,
    return
  }
  func.func @transform_0(%arg0: i32) -> (i32, i32) {
    %c0_i32 = arith.constant 0 : i32
    %c0_i32_0 = arith.constant 0 : i32
    return %arg0, %c0_i32 : i32, i32
  }
  func.func @transform_1(%arg0: i32) -> (i32, i32) {
    %c0_i32 = arith.constant 0 : i32
    %c0_i32_0 = arith.constant 0 : i32
    %c0_i32_1 = arith.constant 0 : i32
    return %c0_i32, %c0_i32_0 : i32, i32
  }
  func.func @transform_2(%arg0: i32) -> (i32, i32) {
    %c0_i32 = arith.constant 0 : i32
    %c0_i32_0 = arith.constant 0 : i32
    %c0_i32_1 = arith.constant 0 : i32
    return %c0_i32, %c0_i32_0 : i32, i32
  }
  func.func @transform_3(%arg0: i32) -> (i32, i32) {
    %c0_i32 = arith.constant 0 : i32
    %c0_i32_0 = arith.constant 0 : i32
    %c0_i32_1 = arith.constant 0 : i32
    return %c0_i32, %c0_i32_0 : i32, i32
  }
  func.func @transform_4(%arg0: i32) -> (i32, i32) {
    %c0_i32 = arith.constant 0 : i32
    %c0_i32_0 = arith.constant 0 : i32
    %c0_i32_1 = arith.constant 0 : i32
    return %c0_i32, %c0_i32_0 : i32, i32
  }
  func.func @transform_5(%arg0: i32) -> (i32, i32) {
    %c0_i32 = arith.constant 0 : i32
    %c0_i32_0 = arith.constant 0 : i32
    %c0_i32_1 = arith.constant 0 : i32
    return %c0_i32, %c0_i32_0 : i32, i32
  }
  func.func @transform_6(%arg0: i32) -> (i32, i32) {
    %c0_i32 = arith.constant 0 : i32
    %c0_i32_0 = arith.constant 0 : i32
    %c0_i32_1 = arith.constant 0 : i32
    return %c0_i32, %c0_i32_0 : i32, i32
  }
  func.func @transform_7(%arg0: i32) -> (i32, i32) {
    %c0_i32 = arith.constant 0 : i32
    %c0_i32_0 = arith.constant 0 : i32
    return %arg0, %c0_i32 : i32, i32
  }
}

</mosaic_0001>

<bundles_post_ra>
// kernel: tpu_custom_call.1
= control target key start
LH: loop header
LB: loop body
LE: loop exit
PB: predicated region body
PF: predicated region fallthrough
CT: control target
= control target key end

     0   :  { %12 = vsyncpa [#allocation3], 0  ;;  %s477_s0 = inlined_call_operand.hbm [shape: f32[8,256], index: 0, kind: input, shape index: {}]   ;;  %s478_s1 = inlined_call_operand.hbm [shape: f32[256,128], index: 1, kind: input, shape index: {}]   ;;  %s479_s2 = inlined_call_operand.vmem [shape: f32[1,128], index: 2, kind: input, shape index: {}]   ;;  %s480_s3 = inlined_call_operand.hbm [shape: f32[128,128], index: 3, kind: input, shape index: {}]   ;;  %s481_s4 = inlined_call_operand.vmem [shape: f32[1,128], index: 4, kind: input, shape index: {}]   ;;  %s482_s5 = inlined_call_operand.hbm [shape: f32[128,128], index: 5, kind: input, shape index: {}]   ;;  %s483_s6 = inlined_call_operand.vmem [shape: f32[1,128], index: 6, kind: input, shape index: {}]   ;;  %s484_s7 = inlined_call_operand.hbm [shape: f32[8,128], index: 7, kind: output, shape index: {}]  }
   0x1   :  { %13 = vsyncpa [#allocation6], 0 }
   0x2   :  { %14 = vsyncpa [#allocation9], 0  ;;  %s31_s26 = sshll.u32 %s478_s1, 4  ;;  %s32_s26 = int_to_ptr.hbm [resolvable:$true] %s31_s26 }
   0x3   :  { %15 = vsyncpa [#allocation4], 0  ;;  %s406_s27 = smov [#allocation5]   ;;  %s21_s8 = sshll.u32 %s477_s0, 4  ;;  %s22_s8 = int_to_ptr.hbm [resolvable:$true] %s21_s8 }
   0x4   :  { %s33_s28 = sshll.u32 %s406_s27, 4  ;;  %s407_s9 = smov 128   ;;  %s34_s28 = int_to_ptr.vmem [resolvable:$true] %s33_s28 }
   0x5   :  { %s408_s10 = smov 8   ;;  %s409_s11 = smov [#allocation2]  }
   0x6   :  { %39 = dma.hbm_to_vmem [thread:$0]  %s32_s26, 4096, %s34_s28, [#allocation6], %s407_s9, %s407_s9, %s408_s10  }
   0x7   :  { %s23_s12 = sshll.u32 %s409_s11, 4  ;;  %s46_s15 = sshll.u32 %s480_s3, 4  ;;  %s24_s12 = int_to_ptr.vmem [resolvable:$true] %s23_s12  ;;  %s47_s15 = int_to_ptr.hbm [resolvable:$true] %s46_s15 }
   0x8   :  { %26 = dma.hbm_to_vmem [thread:$0]  %s22_s8, 256, %s24_s12, [#allocation3]  }
   0x9   :  { %s61_s17 = sshll.u32 %s482_s5, 4  ;;  %s410_s18 = smov [#allocation7]   ;;  %s62_s17 = int_to_ptr.hbm [resolvable:$true] %s61_s17 }
   0xa   :  { %s48_s19 = sshll.u32 %s410_s18, 4  ;;  %s411_s0 = smov [#allocation8]   ;;  %s49_s19 = int_to_ptr.vmem [resolvable:$true] %s48_s19 }
   0xb   :  { %54 = dma.hbm_to_vmem [thread:$0]  %s47_s15, 2048, %s49_s19, [#allocation6], %s407_s9, %s407_s9, %s408_s10  }
   0xc   :  { %s63_s20 = sshll.u32 %s411_s0, 4  ;;  %s64_s20 = int_to_ptr.vmem [resolvable:$true] %s63_s20 }
   0xd   :  { %69 = dma.hbm_to_vmem [thread:$0]  %s62_s17, 2048, %s64_s20, [#allocation9], %s407_s9, %s407_s9, %s408_s10  }
   0xe   :  { %398 = dma.done.wait [#allocation3], 256  }
   0xf   :  { %399 = vsyncadd [#allocation3], 4294967040 }
  0x10   :  { %400 = dma.done.wait [#allocation6], 6144  }
  0x11   :  { %401 = vsyncadd [#allocation6], 4294961152 }
  0x12   :  { %402 = dma.done.wait [#allocation9], 2048  }
  0x13   :  { %403 = vsyncadd [#allocation9], 4294965248  ;;  %v105_v0 = vld [vmem:[#allocation5 + $0x78] sm:$0xff]  ;;  %v104_v1 = vld [vmem:[#allocation5 + $0x70] sm:$0xff]  ;;  %s412_s24 = smov [#allocation10]   ;;  %s256_s28 = sshll.u32 %s484_s7, 4  ;;  %s257_s28 = int_to_ptr.hbm [resolvable:$true] %s256_s28 }
  0x14   :  { %v121_v2 = vld [vmem:[#allocation5 + $0xf8] sm:$0xff]  ;;  %126 = vmatpush.msra.mxu0 %v105_v0  ;;  %v120_v3 = vld [vmem:[#allocation5 + $0xf0] sm:$0xff]  ;;  %v103_v4 = vld [vmem:[#allocation5 + $0x68] sm:$0xff]  ;;  %s254_s25 = sshll.u32 %s412_s24, 4  ;;  %s255_s25 = int_to_ptr.vmem [resolvable:$true] %s254_s25 }
  0x15   :  { %146 = vmatpush.msra.mxu1 %v121_v2  ;;  %v119_v5 = vld [vmem:[#allocation5 + $0xe8] sm:$0xff]  ;;  %v102_v6 = vld [vmem:[#allocation5 + $0x60] sm:$0xff]  ;;  %v101_v8 = vld [vmem:[#allocation5 + $0x58] sm:$0xff] }
  0x16   :  { %127 = vmatpush.msra.mxu0 %v104_v1  ;;  %v118_v7 = vld [vmem:[#allocation5 + $0xe0] sm:$0xff]  ;;  %v117_v9 = vld [vmem:[#allocation5 + $0xd8] sm:$0xff]  ;;  %v100_v10 = vld [vmem:[#allocation5 + $0x50] sm:$0xff] }
  0x17   :  { %147 = vmatpush.msra.mxu1 %v120_v3  ;;  %v116_v11 = vld [vmem:[#allocation5 + $0xd0] sm:$0xff]  ;;  %v99_v12 = vld [vmem:[#allocation5 + $0x48] sm:$0xff]  ;;  %v182_v14 = vld [vmem:[#allocation7 + $0x78] sm:$0xff] }
  0x18   :  { %128 = vmatpush.msra.mxu0 %v103_v4  ;;  %v115_v13 = vld [vmem:[#allocation5 + $0xc8] sm:$0xff]  ;;  %v181_v15 = vld [vmem:[#allocation7 + $0x70] sm:$0xff]  ;;  %v98_v16 = vld [vmem:[#allocation5 + $0x40] sm:$0xff]  ;;  %187 = vmatpush.msra.mxu2 %v182_v14 }
  0x19   :  { %148 = vmatpush.msra.mxu1 %v119_v5  ;;  %v114_v17 = vld [vmem:[#allocation5 + $0xc0] sm:$0xff]  ;;  %v180_v18 = vld [vmem:[#allocation7 + $0x68] sm:$0xff]  ;;  %v97_v19 = vld [vmem:[#allocation5 + $0x38] sm:$0xff] }
  0x1a   :  { %129 = vmatpush.msra.mxu0 %v102_v6  ;;  %v113_v20 = vld [vmem:[#allocation5 + $0xb8] sm:$0xff]  ;;  %188 = vmatpush.msra.mxu2 %v181_v15  ;;  %v96_v21 = vld [vmem:[#allocation5 + $0x30] sm:$0xff]  ;;  %v179_v22 = vld [vmem:[#allocation7 + $0x60] sm:$0xff] }
  0x1b   :  { %149 = vmatpush.msra.mxu1 %v118_v7  ;;  %v112_v23 = vld [vmem:[#allocation5 + $0xb0] sm:$0xff]  ;;  %v178_v24 = vld [vmem:[#allocation7 + $0x58] sm:$0xff]  ;;  %v95_v25 = vld [vmem:[#allocation5 + $0x28] sm:$0xff] }
  0x1c   :  { %130 = vmatpush.msra.mxu0 %v101_v8  ;;  %189 = vmatpush.msra.mxu2 %v180_v18  ;;  %v111_v26 = vld [vmem:[#allocation5 + $0xa8] sm:$0xff]  ;;  %v177_v27 = vld [vmem:[#allocation7 + $0x50] sm:$0xff]  ;;  %v94_v28 = vld [vmem:[#allocation5 + $0x20] sm:$0xff] }
  0x1d   :  { %150 = vmatpush.msra.mxu1 %v117_v9  ;;  %v110_v29 = vld [vmem:[#allocation5 + $0xa0] sm:$0xff]  ;;  %v176_v30 = vld [vmem:[#allocation7 + $0x48] sm:$0xff]  ;;  %v93_v31 = vld [vmem:[#allocation5 + $0x18] sm:$0xff] }
  0x1e   :  { %131 = vmatpush.msra.mxu0 %v100_v10  ;;  %190 = vmatpush.msra.mxu2 %v179_v22  ;;  %v109_v32 = vld [vmem:[#allocation5 + $0x98] sm:$0xff]  ;;  %v175_v33 = vld [vmem:[#allocation7 + $0x40] sm:$0xff]  ;;  %v92_v34 = vld [vmem:[#allocation5 + $0x10] sm:$0xff] }
  0x1f   :  { %151 = vmatpush.msra.mxu1 %v116_v11  ;;  %v108_v35 = vld [vmem:[#allocation5 + $0x90] sm:$0xff]  ;;  %v174_v36 = vld [vmem:[#allocation7 + $0x38] sm:$0xff]  ;;  %v91_v37 = vld [vmem:[#allocation5 + $0x8] sm:$0xff] }
  0x20   :  { %132 = vmatpush.msra.mxu0 %v99_v12  ;;  %191 = vmatpush.msra.mxu2 %v178_v24  ;;  %v107_v38 = vld [vmem:[#allocation5 + $0x88] sm:$0xff]  ;;  %v173_v39 = vld [vmem:[#allocation7 + $0x30] sm:$0xff]  ;;  %v90_v40 = vld [vmem:[#allocation5] sm:$0xff] }
  0x21   :  { %152 = vmatpush.msra.mxu1 %v115_v13  ;;  %v106_v41 = vld [vmem:[#allocation5 + $0x80] sm:$0xff]  ;;  %v88_v42 = vld [vmem:[#allocation2] sm:$0xff]  ;;  %v89_v43 = vld [vmem:[#allocation2 + $0x8] sm:$0xff] }
  0x22   :  { %133 = vmatpush.msra.mxu0 %v98_v16  ;;  %192 = vmatpush.msra.mxu2 %v177_v27  ;;  %v172_v44 = vld [vmem:[#allocation7 + $0x28] sm:$0xff]  ;;  %v171_v45 = vld [vmem:[#allocation7 + $0x20] sm:$0xff]  ;;  %v170_v46 = vld [vmem:[#allocation7 + $0x18] sm:$0xff] }
  0x23   :  { %153 = vmatpush.msra.mxu1 %v114_v17  ;;  %v169_v47 = vld [vmem:[#allocation7 + $0x10] sm:$0xff]  ;;  %v168_v48 = vld [vmem:[#allocation7 + $0x8] sm:$0xff]  ;;  %v167_v49 = vld [vmem:[#allocation7] sm:$0xff] }
  0x24   :  { %134 = vmatpush.msra.mxu0 %v97_v19  ;;  %193 = vmatpush.msra.mxu2 %v176_v30  ;;  %v223_v50 = vld [vmem:[#allocation8 + $0x78] sm:$0xff]  ;;  %v222_v51 = vld [vmem:[#allocation8 + $0x70] sm:$0xff]  ;;  %v221_v52 = vld [vmem:[#allocation8 + $0x68] sm:$0xff] }
  0x25   :  { %154 = vmatpush.msra.mxu1 %v113_v20  ;;  %228 = vmatpush.msra.mxu3 %v223_v50  ;;  %v220_v53 = vld [vmem:[#allocation8 + $0x60] sm:$0xff]  ;;  %v219_v54 = vld [vmem:[#allocation8 + $0x58] sm:$0xff]  ;;  %v218_v55 = vld [vmem:[#allocation8 + $0x50] sm:$0xff] }
  0x26   :  { %135 = vmatpush.msra.mxu0 %v96_v21  ;;  %194 = vmatpush.msra.mxu2 %v175_v33  ;;  %v217_v56 = vld [vmem:[#allocation8 + $0x48] sm:$0xff]  ;;  %v216_v57 = vld [vmem:[#allocation8 + $0x40] sm:$0xff]  ;;  %v215_v58 = vld [vmem:[#allocation8 + $0x38] sm:$0xff] }
  0x27   :  { %155 = vmatpush.msra.mxu1 %v112_v23  ;;  %229 = vmatpush.msra.mxu3 %v222_v51  ;;  %v214_v59 = vld [vmem:[#allocation8 + $0x30] sm:$0xff]  ;;  %v213_v60 = vld [vmem:[#allocation8 + $0x28] sm:$0xff]  ;;  %v212_v61 = vld [vmem:[#allocation8 + $0x20] sm:$0xff] }
  0x28   :  { %136 = vmatpush.msra.mxu0 %v95_v25  ;;  %195 = vmatpush.msra.mxu2 %v174_v36  ;;  %v275_v62 = vld [vmem:[%s479_s2] ss:$0 sm:$0xff]  ;;  %v211_v63 = vld [vmem:[#allocation8 + $0x18] sm:$0xff]  ;;  %v209_v6 = vld [vmem:[#allocation8 + $0x8] sm:$0xff] }
  0x29   :  { %156 = vmatpush.msra.mxu1 %v111_v26  ;;  %230 = vmatpush.msra.mxu3 %v221_v52  ;;  %v210_v5 = vld [vmem:[#allocation8 + $0x10] sm:$0xff]  ;;  %v208_v7 = vld [vmem:[#allocation8] sm:$0xff] }
  0x2a   :  { %137 = vmatpush.msra.mxu0 %v94_v28  ;;  %196 = vmatpush.msra.mxu2 %v173_v39  ;;  %v276_v8 = vld [vmem:[%s481_s4] ss:$0 sm:$0xff] }
  0x2b   :  { %157 = vmatpush.msra.mxu1 %v110_v29  ;;  %231 = vmatpush.msra.mxu3 %v220_v53  ;;  %v277_v12 = vld [vmem:[%s483_s6] ss:$0 sm:$0xff] }
  0x2c   :  { %138 = vmatpush.msra.mxu0 %v93_v31  ;;  %197 = vmatpush.msra.mxu2 %v172_v44 }
  0x2d   :  { %158 = vmatpush.msra.mxu1 %v109_v32  ;;  %232 = vmatpush.msra.mxu3 %v219_v54 }
  0x2e   :  { %139 = vmatpush.msra.mxu0 %v92_v34  ;;  %198 = vmatpush.msra.mxu2 %v171_v45 }
  0x2f   :  { %159 = vmatpush.msra.mxu1 %v108_v35  ;;  %233 = vmatpush.msra.mxu3 %v218_v55 }
  0x30   :  { %140 = vmatpush.msra.mxu0 %v91_v37  ;;  %199 = vmatpush.msra.mxu2 %v170_v46 }
  0x31   :  { %160 = vmatpush.msra.mxu1 %v107_v38  ;;  %234 = vmatpush.msra.mxu3 %v217_v56 }
  0x32   :  { %141 = vmatpush.msra.mxu0 %v90_v40  ;;  %200 = vmatpush.msra.mxu2 %v169_v47 }
  0x33   :  { %161 = vmatpush.msra.mxu1 %v106_v41  ;;  %142 = vmatmul.f32.vlgmr.msra.gmra.mxu0 %v88_v42 }
  0x34   :  { %162 = vmatmul.f32.vlgmr.msra.gmra.mxu1 %v89_v43  ;;  %201 = vmatpush.msra.mxu2 %v168_v48 }
  0x35   :  { %235 = vmatpush.msra.mxu3 %v216_v57 }
  0x36   :  { %202 = vmatpush.msra.mxu2 %v167_v49 }
  0x37   :  { %236 = vmatpush.msra.mxu3 %v215_v58 }
  0x39   :  { %237 = vmatpush.msra.mxu3 %v214_v59 }
  0x3b   :  { %238 = vmatpush.msra.mxu3 %v213_v60 }
  0x3d   :  { %239 = vmatpush.msra.mxu3 %v212_v61 }
  0x3f   :  { %240 = vmatpush.msra.mxu3 %v211_v63 }
  0x41   :  { %241 = vmatpush.msra.mxu3 %v210_v5 }
  0x43   :  { %242 = vmatpush.msra.mxu3 %v209_v6 }
  0x45   :  { %243 = vmatpush.msra.mxu3 %v208_v7 }
  0xb0   :  { %v143_v0 = vpop.f32.mrf.mxu0 }
  0xb1   :  { %v163_v1 = vpop.f32.mrf.mxu1  ;;  %v144_v2 = vadd.f32 %v275_v62, %v143_v0 }
  0xb3   :  { %v164_v3 = vadd.f32 %v163_v1, %v144_v2 }
  0xb5   :  { %v166_v4 = vmax.f32 %v164_v3, 0.0 }
  0xb7   :  { %203 = vmatmul.f32.vlgmr.msra.gmra.mxu2 %v166_v4 }
 0x13a   :  { %v204_v9 = vpop.f32.mrf.mxu2 }
 0x13b   :  { %v205_v10 = vadd.f32 %v276_v8, %v204_v9 }
 0x13d   :  { %v207_v11 = vmax.f32 %v205_v10, 0.0 }
 0x13f   :  { %244 = vmatmul.f32.vlgmr.msra.gmra.mxu3 %v207_v11 }
 0x1c2   :  { %v245_v13 = vpop.f32.mrf.mxu3 }
 0x1c3   :  { %v246_v14 = vadd.f32 %v277_v12, %v245_v13 }
 0x1c5   :  { %248 = vst [vmem:[#allocation10] sm:$0xff] %v246_v14 }
 0x1c6   :  { %259 = dma.vmem_to_hbm [thread:$0]  %s255_s25, 128, %s257_s28, [#allocation4]  }
 0x1c7   :  { %404 = dma.done.wait [#allocation4], 128  }
 0x1c8   :  { %405 = vsyncadd [#allocation4], 4294967168 }
 0x1c9   :  { %264 = vsyncpa [#allocation3], 1 }
 0x1ca   :  { %265 = vsyncpa [#allocation6], 1 }
 0x1cb   :  { %266 = vsyncpa [#allocation9], 1 }
 0x1cc   :  { %267 = vsyncpa [#allocation4], 1 }

</bundles_post_ra>
